<compile_context>
chip_gen: v5e
topology: v5e:2x2
jax: 0.10.0
libtpu: 0.0.40
codegen_flags: <defaults>
</compile_context>

<pallas_src>
import functools

import jax
import jax.numpy as jnp
from jax.experimental import pallas as pl
from jax.experimental.pallas import tpu as pltpu

_LANE = 128
_ACC_ROWS = 512                      # fixed accumulator: 512 x 128 x 4 B = 256 KiB
_TARGET_BLOCK_BYTES = 4 * 1024 * 1024  # ~4 MiB per input per pipeline buffer


def _rmse_sum_kernel(x_ref, y_ref, out_ref, acc_ref, *,
                     steps_per_part, steps_total, block_rows, acc_rows,
                     num_chunks, total_rows, ragged):
    p = pl.program_id(0)           # part (TensorCore split axis, "parallel")
    i = pl.program_id(1)           # step within the part ("arbitrary")
    step_global = p * steps_per_part + i

    @pl.when(i == 0)
    def _():
        acc_ref[...] = jnp.zeros_like(acc_ref)

    def accumulate(masked):
        # Static chunk loop: per-chunk load + sub/mul/add into the small
        # accumulator.  Pure VPU work; no cross-lane traffic in the hot loop.
        for c in range(num_chunks):
            r0 = c * acc_rows
            xs = x_ref[r0:r0 + acc_rows, :].astype(jnp.float32)
            ys = y_ref[r0:r0 + acc_rows, :].astype(jnp.float32)
            d = xs - ys
            dd = d * d
            if masked:
                row = jax.lax.broadcasted_iota(jnp.int32, (acc_rows, _LANE), 0)
                grow = step_global * block_rows + r0 + row
                dd = jnp.where(grow < total_rows, dd, jnp.float32(0.0))
            acc_ref[...] += dd

    if ragged:
        # Cold path: only the last global block has rows past the end of the
        # array (boundary block, unspecified data) that must be masked out.
        is_last_global = step_global == steps_total - 1

        @pl.when(jnp.logical_not(is_last_global))
        def _():
            accumulate(False)

        @pl.when(is_last_global)
        def _():
            accumulate(True)
    else:
        accumulate(False)

    @pl.when(i == pl.num_programs(1) - 1)
    def _():
        # Single cross-lane/sublane reduction per part, over the small acc.
        psum = jnp.sum(acc_ref[...])
        out_ref[...] = jnp.full(out_ref.shape, psum, dtype=out_ref.dtype)


def rmse_loss(x, y):
    assert x.shape == y.shape, "x and y must have the same shape"
    n_elems = x.size

    xf = x.reshape(-1)
    yf = y.reshape(-1)

    # Pad to a lane multiple only when strictly required; zero padding on both
    # inputs contributes 0 to sum((x - y)^2).  allow_input_fusion (below) lets
    # XLA fuse this pad into the kernel's input DMA instead of materializing.
    pad = (-n_elems) % _LANE
    if pad:
        xf = jnp.pad(xf, (0, pad))
        yf = jnp.pad(yf, (0, pad))

    rows = xf.size // _LANE
    x2 = xf.reshape(rows, _LANE)
    y2 = yf.reshape(rows, _LANE)

    # Dtype-aware block size: ~4 MiB of input per pipeline buffer, rows kept a
    # multiple of _ACC_ROWS (hence of 8/16/32 sublane packing).
    itemsize = x2.dtype.itemsize
    target_rows = max(
        _ACC_ROWS,
        ((_TARGET_BLOCK_BYTES // (_LANE * itemsize)) // _ACC_ROWS) * _ACC_ROWS,
    )
    block_rows = rows if rows <= target_rows else target_rows
    steps_total = pl.cdiv(rows, block_rows)
    ragged = (rows % block_rows) != 0

    # 2-way split over a "parallel" leading axis (second TensorCore on v7x).
    num_parts = 2 if (steps_total >= 2 and steps_total % 2 == 0) else 1
    steps_per_part = steps_total // num_parts

    # Small fixed accumulator, chunked accumulation when the block is large.
    if block_rows > _ACC_ROWS and block_rows % _ACC_ROWS == 0:
        acc_rows = _ACC_ROWS
    else:
        acc_rows = block_rows
    num_chunks = block_rows // acc_rows

    kernel = functools.partial(
        _rmse_sum_kernel,
        steps_per_part=steps_per_part,
        steps_total=steps_total,
        block_rows=block_rows,
        acc_rows=acc_rows,
        num_chunks=num_chunks,
        total_rows=rows,
        ragged=ragged,
    )

    # 2 inputs x 2 pipeline buffers x block + accumulator, plus headroom.
    block_bytes = block_rows * _LANE * itemsize
    acc_bytes = acc_rows * _LANE * 4
    vmem_limit = 2 * 2 * block_bytes + acc_bytes + (8 << 20)
    vmem_limit = int(max(16 << 20, min(vmem_limit, 48 << 20)))

    in_index_map = lambda p_, i_: (p_ * steps_per_part + i_, 0)

    cost = pl.CostEstimate(
        flops=3 * n_elems,                                   # sub, mul, add
        transcendentals=0,
        bytes_accessed=(x.dtype.itemsize + y.dtype.itemsize) * n_elems
        + num_parts * 8 * _LANE * 4,
    )

    compiler_params = pltpu.CompilerParams(
        dimension_semantics=("parallel", "arbitrary"),
        vmem_limit_bytes=vmem_limit,
        allow_input_fusion=[True, True] if pad else None,
    )

    partial_sums = pl.pallas_call(
        kernel,
        out_shape=jax.ShapeDtypeStruct((num_parts, 8, _LANE), jnp.float32),
        grid_spec=pltpu.PrefetchScalarGridSpec(
            num_scalar_prefetch=0,
            grid=(num_parts, steps_per_part),
            in_specs=[
                pl.BlockSpec((block_rows, _LANE), in_index_map),
                pl.BlockSpec((block_rows, _LANE), in_index_map),
            ],
            out_specs=pl.BlockSpec((1, 8, _LANE), lambda p_, i_: (p_, 0, 0)),
            scratch_shapes=[pltpu.VMEM((acc_rows, _LANE), jnp.float32)],
        ),
        compiler_params=compiler_params,
        cost_estimate=cost,
    )(x2, y2)

    # Combine per-part sums; mean, sqrt and the (outside-the-sqrt) epsilon
    # exactly match the PyTorch module: sqrt(MSE(x, y)) + 1e-6.
    total_sq = jnp.sum(partial_sums[:, 0, 0])
    mse = total_sq / jnp.float32(n_elems)
    return jnp.sqrt(mse) + jnp.float32(1e-6)


if __name__ == "__main__":
    key = jax.random.PRNGKey(0)
    kx, ky = jax.random.split(key)
    # Shapes consistent with a CNN prediction/target pair (NCHW).
    x = jax.random.normal(kx, (2, 4, 16, 16), dtype=jnp.float32)
    y = jax.random.normal(ky, (2, 4, 16, 16), dtype=jnp.float32)

    loss = jax.block_until_ready(rmse_loss(x, y))

    # Reference check in plain JAX.
    ref = jnp.sqrt(jnp.mean((x - y) ** 2)) + 1e-6
    assert jnp.allclose(loss, ref, rtol=1e-5, atol=1e-6), (loss, ref)

    print("KERNEL_OK")
</pallas_src>

<mosaic_0001>
module attributes {stable_mosaic.version = 11 : i64} {
  func.func @_rmse_sum_kernel(%arg0: i32, %arg1: i32, %arg2: memref<16x128xf32, #tpu.memory_space<vmem>>, %arg3: memref<16x128xf32, #tpu.memory_space<vmem>>, %arg4: memref<1x8x128xf32, #tpu.memory_space<vmem>>, %arg5: memref<16x128xf32, #tpu.memory_space<vmem>>) attributes {dimension_semantics = [#tpu.dimension_semantics<parallel>, #tpu.dimension_semantics<arbitrary>], iteration_bounds = array<i64: 1, 1>, scalar_prefetch = 0 : i64, scratch_operands = 1 : i64, tpu.core_type = #tpu.core_type<tc>, window_params = [{transform_indices = @transform_0, window_bounds = array<i64: 16, 128>}, {transform_indices = @transform_1, window_bounds = array<i64: 16, 128>}, {transform_indices = @transform_2, window_bounds = array<i64: 1, 8, 128>}]} {
    %c0_i32 = arith.constant 0 : i32
    %0 = arith.cmpi eq, %arg1, %c0_i32 : i32
    %1 = arith.extui %0 : i1 to i32
    %c0_i32_0 = arith.constant 0 : i32
    %2 = arith.cmpi ne, %1, %c0_i32_0 : i32
    scf.if %2 {
      %cst = arith.constant 0.000000e+00 : f32
      %13 = vector.broadcast %cst : f32 to vector<16x128xf32>
      %c0_10 = arith.constant 0 : index
      %c0_11 = arith.constant 0 : index
      %14 = vector.load %arg5[%c0_10, %c0_11] : memref<16x128xf32, #tpu.memory_space<vmem>>, vector<16x128xf32>
      tpu.vector_store %arg5[%c0_10, %c0_11], %13 {strides = array<i32>} : memref<16x128xf32, #tpu.memory_space<vmem>>, vector<16x128xf32>,
    } else {
    }
    %c0 = arith.constant 0 : index
    %c0_1 = arith.constant 0 : index
    %3 = vector.load %arg2[%c0, %c0_1] : memref<16x128xf32, #tpu.memory_space<vmem>>, vector<16x128xf32>
    %c0_2 = arith.constant 0 : index
    %c0_3 = arith.constant 0 : index
    %4 = vector.load %arg3[%c0_2, %c0_3] : memref<16x128xf32, #tpu.memory_space<vmem>>, vector<16x128xf32>
    %5 = arith.subf %3, %4 : vector<16x128xf32>
    %6 = arith.mulf %5, %5 : vector<16x128xf32>
    %c0_4 = arith.constant 0 : index
    %c0_5 = arith.constant 0 : index
    %7 = vector.load %arg5[%c0_4, %c0_5] : memref<16x128xf32, #tpu.memory_space<vmem>>, vector<16x128xf32>
    %8 = arith.addf %7, %6 : vector<16x128xf32>
    %c0_6 = arith.constant 0 : index
    %c0_7 = arith.constant 0 : index
    %9 = vector.load %arg5[%c0_6, %c0_7] : memref<16x128xf32, #tpu.memory_space<vmem>>, vector<16x128xf32>
    tpu.vector_store %arg5[%c0_6, %c0_7], %8 {strides = array<i32>} : memref<16x128xf32, #tpu.memory_space<vmem>>, vector<16x128xf32>,
    %c0_i32_8 = arith.constant 0 : i32
    %10 = arith.cmpi eq, %arg1, %c0_i32_8 : i32
    %11 = arith.extui %10 : i1 to i32
    %c0_i32_9 = arith.constant 0 : i32
    %12 = arith.cmpi ne, %11, %c0_i32_9 : i32
    scf.if %12 {
      %c0_10 = arith.constant 0 : index
      %c0_11 = arith.constant 0 : index
      %13 = vector.load %arg5[%c0_10, %c0_11] : memref<16x128xf32, #tpu.memory_space<vmem>>, vector<16x128xf32>
      %14 = vector.shape_cast %13 : vector<16x128xf32> to vector<1x16x128xf32>
      %cst = arith.constant dense<0.000000e+00> : vector<1xf32>
      %15 = vector.multi_reduction <add>, %14, %cst [1, 2] : vector<1x16x128xf32> to vector<1xf32>
      %16 = vector.shape_cast %15 : vector<1xf32> to vector<1x1x1xf32>
      %17 = vector.extract %16[0, 0, 0] : f32 from vector<1x1x1xf32>
      %18 = vector.broadcast %17 : f32 to vector<1x8x128xf32>
      %c0_12 = arith.constant 0 : index
      %c0_13 = arith.constant 0 : index
      %c0_14 = arith.constant 0 : index
      %19 = vector.load %arg4[%c0_12, %c0_13, %c0_14] : memref<1x8x128xf32, #tpu.memory_space<vmem>>, vector<1x8x128xf32>
      tpu.vector_store %arg4[%c0_12, %c0_13, %c0_14], %18 {strides = array<i32>} : memref<1x8x128xf32, #tpu.memory_space<vmem>>, vector<1x8x128xf32>,
    } else {
    }
    return
  }
  func.func @transform_0(%arg0: i32, %arg1: i32) -> (i32, i32) {
    %c1_i32 = arith.constant 1 : i32
    %0 = arith.muli %arg0, %c1_i32 : i32
    %1 = arith.addi %0, %arg1 : i32
    %c0_i32 = arith.constant 0 : i32
    %c0_i32_0 = arith.constant 0 : i32
    return %1, %c0_i32 : i32, i32
  }
  func.func @transform_1(%arg0: i32, %arg1: i32) -> (i32, i32) {
    %c1_i32 = arith.constant 1 : i32
    %0 = arith.muli %arg0, %c1_i32 : i32
    %1 = arith.addi %0, %arg1 : i32
    %c0_i32 = arith.constant 0 : i32
    %c0_i32_0 = arith.constant 0 : i32
    return %1, %c0_i32 : i32, i32
  }
  func.func @transform_2(%arg0: i32, %arg1: i32) -> (i32, i32, i32) {
    %c0_i32 = arith.constant 0 : i32
    %c0_i32_0 = arith.constant 0 : i32
    %c0_i32_1 = arith.constant 0 : i32
    return %arg0, %c0_i32, %c0_i32_0 : i32, i32, i32
  }
}

</mosaic_0001>

<bundles_post_ra>
// kernel: tpu_custom_call.1
= control target key start
LH: loop header
LB: loop body
LE: loop exit
PB: predicated region body
PF: predicated region fallthrough
CT: control target
= control target key end

     0   :  { %7 = vsyncpa [#allocation4], 0  ;;  %s225_s0 = inlined_call_operand.hbm [shape: f32[16,128], index: 0, kind: input, shape index: {}]   ;;  %s226_s1 = inlined_call_operand.hbm [shape: f32[16,128], index: 1, kind: input, shape index: {}]   ;;  %s227_s2 = inlined_call_operand.hbm [shape: f32[1,8,128], index: 2, kind: output, shape index: {}]  }
   0x1   :  { %8 = vsyncpa [#allocation7], 0 }
   0x2   :  { %9 = vsyncpa [#allocation5], 0  ;;  %s18_s11 = sshll.u32 %s225_s0, 4  ;;  %s196_s12 = smov [#allocation3]   ;;  %s19_s11 = int_to_ptr.hbm [resolvable:$true] %s18_s11 }
   0x3   :  { %s20_s13 = sshll.u32 %s196_s12, 4  ;;  %s35_s16 = sshll.u32 %s226_s1, 4  ;;  %s21_s13 = int_to_ptr.vmem [resolvable:$true] %s20_s13  ;;  %s36_s16 = int_to_ptr.hbm [resolvable:$true] %s35_s16 }
   0x4   :  { %s197_s17 = smov 128   ;;  %s198_s18 = smov 8  }
   0x5   :  { %26 = dma.hbm_to_vmem [thread:$0]  %s19_s11, 256, %s21_s13, [#allocation4], %s197_s17, %s197_s17, %s198_s18  }
   0x6   :  { %s199_s19 = smov [#allocation6]  }
   0x7   :  { %s37_s20 = sshll.u32 %s199_s19, 4  ;;  %s38_s20 = int_to_ptr.vmem [resolvable:$true] %s37_s20 }
   0x8   :  { %43 = dma.hbm_to_vmem [thread:$0]  %s36_s16, 256, %s38_s20, [#allocation7], %s197_s17, %s197_s17, %s198_s18  }
   0x9   :  { %190 = dma.done.wait [#allocation4], 256  }
   0xa   :  { %191 = vsyncadd [#allocation4], 4294967040 }
   0xb   :  { %192 = dma.done.wait [#allocation7], 256  }
   0xc   :  { %193 = vsyncadd [#allocation7], 4294967040  ;;  %v62_v0 = vld [vmem:[#allocation3] sm:$0xff]  ;;  %v63_v1 = vld [vmem:[#allocation3 + $0x8] sm:$0xff]  ;;  %s200_s0 = smov [#allocation8]   ;;  %s100_s23 = sshll.u32 %s227_s2, 4  ;;  %s101_s23 = int_to_ptr.hbm [resolvable:$true] %s100_s23 }
   0xd   :  { %v64_v2 = vld [vmem:[#allocation6] sm:$0xff]  ;;  %v65_v3 = vld [vmem:[#allocation6 + $0x8] sm:$0xff]  ;;  %s98_s1 = sshll.u32 %s200_s0, 4  ;;  %s99_s1 = int_to_ptr.vmem [resolvable:$true] %s98_s1 }
   0xe   :  { %v66_v4 = vsub.f32 %v62_v0, %v64_v2  ;;  %v67_v5 = vsub.f32 %v63_v1, %v65_v3 }
  0x10   :  { %v68_v6 = vmul.f32 %v66_v4, %v66_v4  ;;  %v69_v7 = vmul.f32 %v67_v5, %v67_v5 }
  0x12   :  { %v81_v8 = vadd.f32 %v69_v7, %v68_v6 }
  0x14   :  { %82 = vadd.xlane.f32.xlu0 %v81_v8 }
  0x87   :  { %v83_v9 = vpop.xlane.xlu0 %82 }
  0x88   :  { %v84_v10 = vrot.slane %v83_v9, 4 }
  0x8a   :  { %v85_v11 = vadd.f32 %v84_v10, %v83_v9 }
  0x8c   :  { %v86_v12 = vrot.slane %v85_v11, 2 }
  0x8e   :  { %v87_v13 = vadd.f32 %v86_v12, %v85_v11 }
  0x90   :  { %v88_v14 = vrot.slane %v87_v13, 1 }
  0x92   :  { %v89_v15 = vadd.f32 %v88_v14, %v87_v13 }
  0x94   :  { %111 = vpush %v89_v15 }
  0xc5   :  { %s112_s24 = spop %111 }
  0xc6   :  { %v91_v16 = vstv %s112_s24 }
  0xc7   :  { %92 = vst [vmem:[#allocation8] sm:$0xff] %v91_v16 }
  0xc8   :  { %103 = dma.vmem_to_hbm [thread:$0]  %s99_s1, 128, %s101_s23, [#allocation5]  }
  0xc9   :  { %194 = dma.done.wait [#allocation5], 128  }
  0xca   :  { %195 = vsyncadd [#allocation5], 4294967168 }
  0xcb   :  { %108 = vsyncpa [#allocation4], 1 }
  0xcc   :  { %109 = vsyncpa [#allocation7], 1 }
  0xcd   :  { %110 = vsyncpa [#allocation5], 1 }

</bundles_post_ra>
